<compile_context>
chip_gen: v7x
topology: tpu7x:2x2x1
jax: 0.10.0
libtpu: 0.0.40
codegen_flags: <defaults>
</compile_context>

<pallas_src>
import functools

import jax
import jax.numpy as jnp
from jax import lax
from jax.experimental import pallas as pl
from jax.experimental.pallas import tpu as pltpu


def _ffm_interact_kernel(x_ref, w_ref, o_ref, proj_ref, *,
                         field_size, batch_block, emb_size, head_num, att_dim,
                         use_res, compute_dtype):
    m_blk = x_ref.shape[0]

    # Fused Q | K | V | (Res) projection: one lane-dense MXU matmul with f32
    # accumulation, parked in VMEM scratch so per-head slices become scheduled loads
    # rather than register spills.
    proj_ref[...] = jnp.dot(x_ref[...], w_ref[...], preferred_element_type=jnp.float32)

    head_outs = []
    for h in range(head_num):            # static unroll; head_num is small
        lo = h * att_dim
        qh = proj_ref[:, lo:lo + att_dim].astype(compute_dtype)                        # (M, d)
        kh = proj_ref[:, emb_size + lo:emb_size + lo + att_dim].astype(compute_dtype)  # (M, d)

        # q @ k^T without an explicit transpose: contract dim 1 of both operands.
        scores = lax.dot_general(qh, kh, (((1,), (1,)), ((), ())),
                                 preferred_element_type=jnp.float32)   # (M, M) f32

        if batch_block > 1:
            # Block-diagonal mask generated in-kernel (fields only attend within
            # their own batch element).  Keep the -1e30 mask strictly in f32.
            row_b = lax.broadcasted_iota(jnp.int32, (m_blk, m_blk), 0) // field_size
            col_b = lax.broadcasted_iota(jnp.int32, (m_blk, m_blk), 1) // field_size
            scores = jnp.where(row_b == col_b, scores, jnp.float32(-1e30))

        m = jnp.max(scores, axis=-1, keepdims=True)             # (M, 1) f32
        e = jnp.exp(scores - m)                                 # (M, M) f32
        denom = jnp.sum(e, axis=-1, keepdims=True)              # (M, 1) f32

        vh = proj_ref[:, 2 * emb_size + lo:2 * emb_size + lo + att_dim].astype(compute_dtype)
        head_out = jnp.dot(e.astype(compute_dtype), vh,
                           preferred_element_type=jnp.float32)  # (M, d) f32
        # Deferred softmax normalization: scale the (M, d) result, not the (M, M) e.
        head_out = head_out * pl.reciprocal(denom, approx=True)
        if use_res:
            # Residual columns read straight from the f32 scratch at the point of use.
            head_out = head_out + proj_ref[:, 3 * emb_size + lo:3 * emb_size + lo + att_dim]
        head_outs.append(jnp.maximum(head_out, 0.0))            # ReLU

    # Single store per grid step: assemble the full (M, E) block once instead of
    # per-head masked partial stores.
    out_blk = head_outs[0] if head_num == 1 else jnp.concatenate(head_outs, axis=-1)
    o_ref[...] = out_blk.astype(o_ref.dtype)


def _num_tensorcores():
    """Best-effort TensorCores-per-chip count (v7x has 2); falls back to 1."""
    try:
        info = pltpu.get_tpu_info()
        for name in ("num_cores", "num_tensorcores", "tensor_core_count",
                     "cores_per_chip", "num_cores_per_chip"):
            n = getattr(info, name, None)
            if n is not None and int(n) > 0:
                return int(n)
    except Exception:
        pass
    try:
        n = getattr(jax.devices()[0], "num_cores", None)
        if n is not None and int(n) > 0:
            return int(n)
    except Exception:
        pass
    return 1


def _choose_batch_block(batch, field_size, target_m=128, num_cores=1):
    """Largest batch block with (8, *)-tileable rows and M <= ~target_m whose grid depth
    is >= 2 and a multiple of the TensorCore count when possible (v7x load balance)."""
    def tiles_ok(c):
        if batch % c:
            return False
        rows = c * field_size
        return rows % 8 == 0 or c == batch   # sublane (8) rule; last dim is full-extent

    target = max(1, target_m // field_size)
    cands = [c for c in range(1, batch + 1) if tiles_ok(c) and c <= target]
    if not cands:
        cands = [c for c in range(1, batch + 1) if tiles_ok(c)] or [batch]

    def steps(c):
        return batch // c

    pref = [c for c in cands if steps(c) >= 2 and steps(c) % num_cores == 0]
    if not pref:
        pref = [c for c in cands if steps(c) % num_cores == 0] or cands
    return max(pref)


def ffm_interacting_layer(inputs, w_query, w_key, w_value, w_res=None,
                          head_num=2, scaling=False, use_res=True,
                          compute_dtype=jnp.bfloat16, target_m=128):
    B, F, E = inputs.shape
    assert E % head_num == 0, "embedding_size must be divisible by head_num"
    d = E // head_num
    if use_res and w_res is None:
        raise ValueError("use_res=True requires w_res")

    # Fold the 1/sqrt(d) score scaling into the query projection weight (free).
    wq = (w_query * (1.0 / (d ** 0.5))) if scaling else w_query
    mats = [wq, w_key, w_value] + ([w_res] if use_res else [])
    w_all = jnp.concatenate(mats, axis=1).astype(compute_dtype)      # (E, 3E or 4E)
    n_out = w_all.shape[1]

    b_blk = _choose_batch_block(B, F, target_m, _num_tensorcores())
    m_blk = b_blk * F
    n_steps = B // b_blk

    x2d = inputs.reshape(B * F, E).astype(compute_dtype)             # (B*F, E)

    kernel = functools.partial(
        _ffm_interact_kernel, field_size=F, batch_block=b_blk, emb_size=E,
        head_num=head_num, att_dim=d, use_res=use_res, compute_dtype=compute_dtype)

    in_bytes = jnp.dtype(compute_dtype).itemsize
    cost = pl.CostEstimate(
        flops=n_steps * (2 * m_blk * E * n_out + head_num * 4 * m_blk * m_blk * d),
        transcendentals=n_steps * head_num * m_blk * m_blk,
        bytes_accessed=(B * F * E * in_bytes + E * n_out * in_bytes
                        + B * F * E * jnp.dtype(inputs.dtype).itemsize),
    )

    out2d = pl.pallas_call(
        kernel,
        out_shape=jax.ShapeDtypeStruct((B * F, E), inputs.dtype),
        grid_spec=pltpu.PrefetchScalarGridSpec(
            num_scalar_prefetch=0,
            grid=(n_steps,),
            in_specs=[
                pl.BlockSpec((m_blk, E), lambda i: (i, 0)),   # activations block
                # Grid-invariant fused weights: constant index_map -> fetched once and
                # kept resident.  (Its spare pipeline buffer is <= 8 KiB at these
                # shapes, so a single-buffered pipeline_mode is not worth the knob.)
                pl.BlockSpec((E, n_out), lambda i: (0, 0)),
            ],
            out_specs=pl.BlockSpec((m_blk, E), lambda i: (i, 0)),
            # Parked f32 projection (Q|K|V|Res) -> bounds per-head vreg live-ranges.
            scratch_shapes=[pltpu.VMEM((m_blk, n_out), jnp.float32)],
        ),
        compiler_params=pltpu.CompilerParams(
            dimension_semantics=("parallel",),
            vmem_limit_bytes=32 * 1024 * 1024,   # well under v7x's 64 MiB physical VMEM
        ),
        cost_estimate=cost,
    )(x2d, w_all)
    return out2d.reshape(B, F, E)


def ffm_interacting_ref(inputs, w_query, w_key, w_value, w_res,
                        head_num=2, scaling=False, use_res=True):
    """Pure-JAX reference mirroring the PyTorch forward exactly."""
    B, F, E = inputs.shape
    d = E // head_num
    q = jnp.einsum('bfe,eo->bfo', inputs, w_query)
    k = jnp.einsum('bfe,eo->bfo', inputs, w_key)
    v = jnp.einsum('bfe,eo->bfo', inputs, w_value)
    qh = jnp.stack(jnp.split(q, head_num, axis=2))   # (H, B, F, d)
    kh = jnp.stack(jnp.split(k, head_num, axis=2))
    vh = jnp.stack(jnp.split(v, head_num, axis=2))
    scores = jnp.einsum('hbik,hbjk->hbij', qh, kh)
    if scaling:
        scores = scores / (d ** 0.5)
    att = jax.nn.softmax(scores, axis=-1)
    res = jnp.einsum('hbij,hbjd->hbid', att, vh)
    res = jnp.concatenate(jnp.split(res, head_num, axis=0), axis=-1)[0]  # (B, F, E)
    if use_res:
        res = res + jnp.einsum('bfe,eo->bfo', inputs, w_res)
    return jax.nn.relu(res)


if __name__ == "__main__":
    key = jax.random.PRNGKey(0)
    kq, kk, kv, kr, kx1, kx2 = jax.random.split(key, 6)

    F, E, H = 8, 32, 2
    w_query = 0.05 * jax.random.normal(kq, (E, E), dtype=jnp.float32)
    w_key = 0.05 * jax.random.normal(kk, (E, E), dtype=jnp.float32)
    w_value = 0.05 * jax.random.normal(kv, (E, E), dtype=jnp.float32)
    w_res = 0.05 * jax.random.normal(kr, (E, E), dtype=jnp.float32)

    # Check 1: tiny batch, f32 MXU path (single batch element per block -> no mask).
    B1 = 2
    x1 = jax.random.normal(kx1, (B1, F, E), dtype=jnp.float32)
    out1 = jax.block_until_ready(ffm_interacting_layer(
        x1, w_query, w_key, w_value, w_res, head_num=H, scaling=False,
        use_res=True, compute_dtype=jnp.float32))
    ref1 = ffm_interacting_ref(x1, w_query, w_key, w_value, w_res,
                               head_num=H, scaling=False, use_res=True)
    assert out1.shape == (B1, F, E)
    assert jnp.allclose(out1, ref1, atol=5e-3, rtol=5e-3), "f32 path mismatch vs reference"

    # Check 2: batch-blocked grid (b_blk > 1, in-kernel block-diagonal mask),
    # bf16 MXU path, scaling enabled.
    B2 = 16
    x2 = jax.random.normal(kx2, (B2, F, E), dtype=jnp.float32)
    out2 = jax.block_until_ready(ffm_interacting_layer(
        x2, w_query, w_key, w_value, w_res, head_num=H, scaling=True,
        use_res=True, compute_dtype=jnp.bfloat16))
    ref2 = ffm_interacting_ref(x2, w_query, w_key, w_value, w_res,
                               head_num=H, scaling=True, use_res=True)
    assert out2.shape == (B2, F, E)
    assert jnp.allclose(out2, ref2, atol=3e-2, rtol=3e-2), "bf16 path mismatch vs reference"

    print("KERNEL_OK")
</pallas_src>

<mosaic_0001>
module attributes {stable_mosaic.version = 11 : i64} {
  func.func @_ffm_interact_kernel(%arg0: i32, %arg1: memref<8x32xf32, #tpu.memory_space<vmem>>, %arg2: memref<32x128xf32, #tpu.memory_space<vmem>>, %arg3: memref<8x32xf32, #tpu.memory_space<vmem>>, %arg4: memref<8x128xf32, #tpu.memory_space<vmem>>) attributes {dimension_semantics = [#tpu.dimension_semantics<parallel>], iteration_bounds = array<i64: 2>, scalar_prefetch = 0 : i64, scratch_operands = 1 : i64, tpu.core_type = #tpu.core_type<tc>, window_params = [{transform_indices = @transform_0, window_bounds = array<i64: 8, 32>}, {pipeline_mode = #tpu.pipeline_mode<synchronous>, transform_indices = @transform_1, window_bounds = array<i64: 32, 128>}, {transform_indices = @transform_2, window_bounds = array<i64: 8, 32>}]} {
    %c0 = arith.constant 0 : index
    %c0_0 = arith.constant 0 : index
    %0 = vector.load %arg1[%c0, %c0_0] : memref<8x32xf32, #tpu.memory_space<vmem>>, vector<8x32xf32>
    %c0_1 = arith.constant 0 : index
    %c0_2 = arith.constant 0 : index
    %1 = vector.load %arg2[%c0_1, %c0_2] : memref<32x128xf32, #tpu.memory_space<vmem>>, vector<32x128xf32>
    %cst = arith.constant dense<0.000000e+00> : vector<8x128xf32>
    %2 = tpu.matmul %0, %1, %cst {dimension_numbers = #tpu.dot_dimension_numbers<[1], [0], [0], [1], [0, 0, 1, 1], [], []>} : vector<8x32xf32>, vector<32x128xf32>, vector<8x128xf32> -> vector<8x128xf32>
    %c0_3 = arith.constant 0 : index
    %c0_4 = arith.constant 0 : index
    %3 = vector.load %arg4[%c0_3, %c0_4] : memref<8x128xf32, #tpu.memory_space<vmem>>, vector<8x128xf32>
    tpu.vector_store %arg4[%c0_3, %c0_4], %2 {strides = array<i32>} : memref<8x128xf32, #tpu.memory_space<vmem>>, vector<8x128xf32>,
    %c0_5 = arith.constant 0 : index
    %c0_6 = arith.constant 0 : index
    %4 = vector.load %arg4[%c0_5, %c0_6] : memref<8x128xf32, #tpu.memory_space<vmem>>, vector<8x16xf32>
    %c0_7 = arith.constant 0 : index
    %c32 = arith.constant 32 : index
    %5 = vector.load %arg4[%c0_7, %c32] : memref<8x128xf32, #tpu.memory_space<vmem>>, vector<8x16xf32>
    %cst_8 = arith.constant dense<0.000000e+00> : vector<8x8xf32>
    %6 = tpu.matmul %4, %5, %cst_8 {dimension_numbers = #tpu.dot_dimension_numbers<[1], [1], [0], [0], [0, 0, 1, 0], [], []>} : vector<8x16xf32>, vector<8x16xf32>, vector<8x8xf32> -> vector<8x8xf32>
    %cst_9 = arith.constant dense<0xFF800000> : vector<8xf32>
    %7 = vector.multi_reduction <maximumf>, %6, %cst_9 [1] : vector<8x8xf32> to vector<8xf32>
    %8 = vector.shape_cast %7 : vector<8xf32> to vector<8x1xf32>
    %9 = vector.broadcast %8 : vector<8x1xf32> to vector<8x8xf32>
    %10 = arith.subf %6, %9 : vector<8x8xf32>
    %11 = math.exp %10 : vector<8x8xf32>
    %cst_10 = arith.constant dense<0.000000e+00> : vector<8xf32>
    %12 = vector.multi_reduction <add>, %11, %cst_10 [1] : vector<8x8xf32> to vector<8xf32>
    %13 = vector.shape_cast %12 : vector<8xf32> to vector<8x1xf32>
    %c0_11 = arith.constant 0 : index
    %c64 = arith.constant 64 : index
    %14 = vector.load %arg4[%c0_11, %c64] : memref<8x128xf32, #tpu.memory_space<vmem>>, vector<8x16xf32>
    %cst_12 = arith.constant dense<0.000000e+00> : vector<8x16xf32>
    %15 = tpu.matmul %11, %14, %cst_12 {dimension_numbers = #tpu.dot_dimension_numbers<[1], [0], [0], [1], [0, 0, 1, 1], [], []>} : vector<8x8xf32>, vector<8x16xf32>, vector<8x16xf32> -> vector<8x16xf32>
    %16 = tpu.reciprocal %13 {approx = true} : vector<8x1xf32> -> vector<8x1xf32>
    %17 = vector.broadcast %16 : vector<8x1xf32> to vector<8x16xf32>
    %18 = arith.mulf %15, %17 : vector<8x16xf32>
    %c0_13 = arith.constant 0 : index
    %c96 = arith.constant 96 : index
    %19 = vector.load %arg4[%c0_13, %c96] : memref<8x128xf32, #tpu.memory_space<vmem>>, vector<8x16xf32>
    %20 = arith.addf %18, %19 : vector<8x16xf32>
    %cst_14 = arith.constant 0.000000e+00 : f32
    %21 = vector.broadcast %cst_14 : f32 to vector<8x16xf32>
    %22 = arith.maximumf %20, %21 : vector<8x16xf32>
    %c0_15 = arith.constant 0 : index
    %c16 = arith.constant 16 : index
    %23 = vector.load %arg4[%c0_15, %c16] : memref<8x128xf32, #tpu.memory_space<vmem>>, vector<8x16xf32>
    %c0_16 = arith.constant 0 : index
    %c48 = arith.constant 48 : index
    %24 = vector.load %arg4[%c0_16, %c48] : memref<8x128xf32, #tpu.memory_space<vmem>>, vector<8x16xf32>
    %cst_17 = arith.constant dense<0.000000e+00> : vector<8x8xf32>
    %25 = tpu.matmul %23, %24, %cst_17 {dimension_numbers = #tpu.dot_dimension_numbers<[1], [1], [0], [0], [0, 0, 1, 0], [], []>} : vector<8x16xf32>, vector<8x16xf32>, vector<8x8xf32> -> vector<8x8xf32>
    %cst_18 = arith.constant dense<0xFF800000> : vector<8xf32>
    %26 = vector.multi_reduction <maximumf>, %25, %cst_18 [1] : vector<8x8xf32> to vector<8xf32>
    %27 = vector.shape_cast %26 : vector<8xf32> to vector<8x1xf32>
    %28 = vector.broadcast %27 : vector<8x1xf32> to vector<8x8xf32>
    %29 = arith.subf %25, %28 : vector<8x8xf32>
    %30 = math.exp %29 : vector<8x8xf32>
    %cst_19 = arith.constant dense<0.000000e+00> : vector<8xf32>
    %31 = vector.multi_reduction <add>, %30, %cst_19 [1] : vector<8x8xf32> to vector<8xf32>
    %32 = vector.shape_cast %31 : vector<8xf32> to vector<8x1xf32>
    %c0_20 = arith.constant 0 : index
    %c80 = arith.constant 80 : index
    %33 = vector.load %arg4[%c0_20, %c80] : memref<8x128xf32, #tpu.memory_space<vmem>>, vector<8x16xf32>
    %cst_21 = arith.constant dense<0.000000e+00> : vector<8x16xf32>
    %34 = tpu.matmul %30, %33, %cst_21 {dimension_numbers = #tpu.dot_dimension_numbers<[1], [0], [0], [1], [0, 0, 1, 1], [], []>} : vector<8x8xf32>, vector<8x16xf32>, vector<8x16xf32> -> vector<8x16xf32>
    %35 = tpu.reciprocal %32 {approx = true} : vector<8x1xf32> -> vector<8x1xf32>
    %36 = vector.broadcast %35 : vector<8x1xf32> to vector<8x16xf32>
    %37 = arith.mulf %34, %36 : vector<8x16xf32>
    %c0_22 = arith.constant 0 : index
    %c112 = arith.constant 112 : index
    %38 = vector.load %arg4[%c0_22, %c112] : memref<8x128xf32, #tpu.memory_space<vmem>>, vector<8x16xf32>
    %39 = arith.addf %37, %38 : vector<8x16xf32>
    %cst_23 = arith.constant 0.000000e+00 : f32
    %40 = vector.broadcast %cst_23 : f32 to vector<8x16xf32>
    %41 = arith.maximumf %39, %40 : vector<8x16xf32>
    %42 = tpu.concatenate %22, %41 in 1 : vector<8x16xf32>, vector<8x16xf32> -> vector<8x32xf32>
    %c0_24 = arith.constant 0 : index
    %c0_25 = arith.constant 0 : index
    %43 = vector.load %arg3[%c0_24, %c0_25] : memref<8x32xf32, #tpu.memory_space<vmem>>, vector<8x32xf32>
    tpu.vector_store %arg3[%c0_24, %c0_25], %42 {strides = array<i32>} : memref<8x32xf32, #tpu.memory_space<vmem>>, vector<8x32xf32>,
    return
  }
  func.func @transform_0(%arg0: i32) -> (i32, i32) {
    %c0_i32 = arith.constant 0 : i32
    %c0_i32_0 = arith.constant 0 : i32
    return %arg0, %c0_i32 : i32, i32
  }
  func.func @transform_1(%arg0: i32) -> (i32, i32) {
    %c0_i32 = arith.constant 0 : i32
    %c0_i32_0 = arith.constant 0 : i32
    %c0_i32_1 = arith.constant 0 : i32
    return %c0_i32, %c0_i32_0 : i32, i32
  }
  func.func @transform_2(%arg0: i32) -> (i32, i32) {
    %c0_i32 = arith.constant 0 : i32
    %c0_i32_0 = arith.constant 0 : i32
    return %arg0, %c0_i32 : i32, i32
  }
}

</mosaic_0001>

<bundles_post_ra>
// kernel: tpu_custom_call.1
= control target key start
LH: loop header
LB: loop body
LE: loop exit
PB: predicated region body
PF: predicated region fallthrough
CT: control target
= control target key end

     0   :  { %7 = vsyncpa [#allocation4], 0  ;;  %s1233_s0 = inlined_call_operand.hbm [shape: f32[16,32], index: 0, kind: input, shape index: {}]   ;;  %s1234_s1 = inlined_call_operand.hbm [shape: f32[32,128], index: 1, kind: input, shape index: {}]   ;;  %s1235_s2 = inlined_call_operand.hbm [shape: f32[16,32], index: 2, kind: output, shape index: {}]  }
   0x1   :  { %9 = vsyncpa [#allocation4 + $0x1], 0 }
   0x2   :  { %10 = vsyncpa [#allocation7], 0 }
   0x3   :  { %11 = vsyncpa [#allocation5], 0 }
   0x4   :  { %13 = vsyncpa [#allocation5 + $0x1], 0  ;;  %s1004_s9 = smov 0   ;;  %s1006_s10 = smov 0  }
   0x5   :  { %s1008_s11 = smov 0   ;;  %s1010_s12 = smov 0  }
   0x6 LB: > { %s1025_s13 = sadd.s32 4294967295, %s972_s12   ;;  %s696_s14 = sadd.s32 4294967294, %s972_s12   ;;  %s972_s12 = sphi %s1010_s12, %s1255_s12   ;;  %s968_s11 = sphi %s1008_s11, %s1254_s11   ;;  %s964_s10 = sphi %s1006_s10, %s1253_s10   ;;  %s960_s9 = sphi %s1004_s9, %s1252_s9  }
   0x7   : > { %p39_p0 = scmp.ne.s32.totalorder %s964_s10, %s960_s9  ;;  %p1236_p1 = scmp.eq.s32.totalorder %s1025_s13, 0 }
   0x8   : > { %p90_p3 = scmp.eq.s32.totalorder %s696_s14, 1  ;;  %p697_p5 = scmp.ge.s32.totalorder %s972_s12, 1 }
   0x9   : > { %p1034_p4 = por %p1236_p1, %p39_p0  ;;  %p97_p7 = scmp.lt.s32.totalorder %s972_s12, 3 }
   0xa   : > { %p1039_p6 = por %p90_p3, %p39_p0  ;;  %s974_s18 = smov [#allocation6]  }
   0xb   : > { %s1239_s15 = scalar_select %p1034_p4, 1, 0 }
   0xc   : > { %s1240_s16 = scalar_select %p1039_p6, 1, 0 }
   0xd   : > { %p1044_p8 = pnand %p697_p5, %p97_p7  ;;  %s109_s19 = sshll.u32 %s974_s18, 4  ;;  %s1048_s19 = int_to_ptr.vmem [resolvable:$true] %s109_s19 }
   0xe   : > { %s1060_s21 = sadd.s32 1, %s972_s12   ;;  %s26_s22 = sadd.s32 1, %s968_s11 }
   0xf   : > { %s1241_s17 = scalar_select %p1044_p8, 1, 0 }
  0x10   : > { %p775_p9 = pneg %p1044_p8  ;;  %s23_s23 = ssub.s32 %s972_s12, %s1060_s21 }
  0x11   : > { %s844_s26 = scalar_lea.hbm %s1234_s1, 512 }
  0x12   : > { %p1055_p11 = pnand %p775_p9, %p1236_p1  ;;  %p845_p12 = scmp.ne.s32.totalorder %s1234_s1, %s844_s26 }
  0x13   : > { %p851_p5 = scmp.lt.u32.totalorder %s844_s26, %s1234_s1 }
  0x14   : > { %p846_p13 = pneg %p1055_p11 }
  0x16   : > { %p847_p0 = pnand %p846_p13, %p845_p12 }
  0x18   : > { %p848_p3 = pneg %p847_p0 }
  0x1a   : > { %p853_p7 = pnand %p851_p5, %p848_p3 }
  0x1c   : > { %856 = shalt.err (!%p853_p7)
}
  0x1d   : > { %s857_s3 = scalar_lea.vmem %s1048_s19, 512  ;;  %p865_p2 = scmp.lt.s32.totalorder %s1048_s19, %s1048_s19 }
  0x1e   : > { %p858_p9 = scmp.ne.s32.totalorder %s1048_s19, %s857_s3  ;;  %p866_p6 = scmp.lt.s32.totalorder %s857_s3, %s857_s3 }
  0x20   : > { %p860_p10 = pnand %p858_p9, %p846_p13  ;;  %p867_p4 = por %p866_p6, %p865_p2 }
  0x22   : > { %p861_p1 = pneg %p860_p10 }
  0x24   : > { %p868_p8 = pnand %p867_p4, %p861_p1 }
  0x26   : > { %871 = shalt.err (!%p868_p8)
}
  0x27   : > { %s975_s4 = smov 128   ;;  %s976_s5 = smov 8  }
  0x28   : > { %778 = dma.hbm_to_vmem [thread:$0]  (!%p1055_p11), %s1234_s1, 512, %s1048_s19, [#allocation7], %s975_s4, %s975_s4, %s976_s5  }
  0x29   : > { %p24_p2 = scmp.eq.s32.totalorder %s23_s23, 0  ;;  %p33_p1 = scmp.ne.s32.totalorder %s968_s11, %s964_s10 }
  0x2a   : > { %p34_p4 = scmp.eq.s32.totalorder %s972_s12, 0  ;;  %p788_p6 = scmp.lt.s32.totalorder %s972_s12, 2 }
  0x2b   : > { %s1091_s8 = scalar_select %p24_p2, %s968_s11, %s26_s22  }
  0x2c   : > { %p35_p8 = por %p34_p4, %p33_p1  ;;  %p1243_p10 = scmp.eq.s32.totalorder %s1025_s13, 1 }
  0x2d   : > { %s123_s18 = sand.u32 1, %s968_s11   ;;  %s701_s24 = sshll.u32 %s972_s12, 7 }
  0x2e   : > { %p1095_p12 = por %p1243_p10, %p33_p1  ;;  %s700_s25 = sshll.u32 %s123_s18, 3 }
  0x2f   : > { %s1104_s27 = scalar_lea.hbm %s1233_s0, %s701_s24  ;;  %s127_s19 = scalar_lea.vmem [#allocation3], %s700_s25 }
  0x30   : > { %s134_s22 = sshll.u32 %s127_s19, 4  ;;  %p1106_p11 = pnand %p788_p6, %p35_p8  ;;  %s1110_s22 = int_to_ptr.vmem [resolvable:$true] %s134_s22 }
  0x31   : > { %s124_s28 = scalar_lea.sflag [#allocation4], %s123_s18  ;;  %s872_s29 = scalar_lea.hbm %s1104_s27, 128 }
  0x32   : > { %p873_p13 = scmp.ne.s32.totalorder %s1104_s27, %s872_s29  ;;  %p874_p0 = pneg %p1106_p11 }
  0x33   : > { %s877_s4 = scalar_lea.hbm %s1233_s0, 256  ;;  %p878_p7 = scmp.lt.u32.totalorder %s1104_s27, %s1233_s0 }
  0x34   : > { %p875_p3 = pnand %p874_p0, %p873_p13  ;;  %p879_p9 = scmp.lt.u32.totalorder %s877_s4, %s872_s29 }
  0x35   : > { %p881_p1 = scmp.lt.u32.totalorder %s872_s29, %s1104_s27 }
  0x36   : > { %p876_p5 = pneg %p875_p3  ;;  %p880_p2 = por %p879_p9, %p878_p7 }
  0x38   : > { %p882_p4 = por %p881_p1, %p880_p2 }
  0x3a   : > { %p883_p6 = pnand %p882_p4, %p876_p5 }
  0x3c   : > { %886 = shalt.err (!%p883_p6)
}
  0x3d   : > { %s887_s7 = scalar_lea.vmem %s1110_s22, 128  ;;  %s977_s18 = smov [#allocation3]  }
  0x3e   : > { %p888_p8 = scmp.ne.s32.totalorder %s1110_s22, %s887_s7  ;;  %s892_s24 = sshll.u32 %s977_s18, 4  ;;  %s893_s24 = int_to_ptr.vmem [resolvable:$false] %s892_s24 }
  0x3f   : > { %s894_s25 = scalar_lea.vmem %s893_s24, 256  ;;  %p895_p3 = scmp.lt.s32.totalorder %s1110_s22, %s893_s24 }
  0x40   : > { %p890_p10 = pnand %p888_p8, %p874_p0  ;;  %p896_p7 = scmp.lt.s32.totalorder %s894_s25, %s887_s7 }
  0x42   : > { %p891_p13 = pneg %p890_p10  ;;  %p897_p9 = por %p896_p7, %p895_p3 }
  0x44   : > { %p898_p2 = pnand %p897_p9, %p891_p13 }
  0x46   : > { %901 = shalt.err (!%p898_p2)
}
  0x47   : > { %782 = dma.hbm_to_vmem [thread:$0]  (!%p1106_p11), %s1104_s27, 128, %s1110_s22, %s124_s28  }
  0x48   : > { %p1246_p5 = scmp.ne.s32.totalorder %s1241_s17, 0 }
  0x49   : > { %s1140_s20 = sand.u32 (!%p1246_p5), 1, %s964_s10   ;;  %p1247_p0 = scmp.ne.s32.totalorder (!%p1246_p5), %s1239_s15, 0 }
  0x4a   : > { %143 = sbr.rel (%p1246_p5) target bundleno = 1147 (0x47b), region = 28  ;;  %s703_s26 = sshll.u32 (!%p1246_p5), %s1140_s20, 3 }
  0x4b   : > { %s146_s19 = scalar_lea.sflag (!%p1246_p5), [#allocation4], %s1140_s20  ;;  %s149_s29 = scalar_lea.vmem (!%p1246_p5), [#allocation3], %s703_s26 }
  0x51   : > { %947 = dma.done.wait (%p1247_p0), %s146_s19, 128  }
  0x52   : > { %949 = vsyncadd (%p1247_p0), %s146_s19, 4294967168  ;;  %p1248_p11 = scmp.eq.s32.totalorder %s1025_s13, 0 }
  0x54   : > { %951 = dma.done.wait (%p1248_p11), [#allocation7], 512   ;;  %p1249_p1 = pmov %p1248_p11 }
  0x55   : > { %v978_v0 = vmov 0.0|0.0   ;;  %vm979_vm0 = vmmov 0   ;;  %v980_v1 = vmov 0.0   ;;  %v175_v2 = vld [vmem:[#allocation6] sm:$0xff]  ;;  %v176_v3 = vld [vmem:[#allocation6 + $0x8] sm:$0xff]  ;;  %v177_v4 = vld [vmem:[#allocation6 + $0x10] sm:$0xff] }
  0x56   : > { %953 = vsyncadd (%p1249_p1), [#allocation7], 4294966784  ;;  %761 = vmatprep.subr.bf16.mxu0 %v978_v0  ;;  %738 = vmatprep.mubr.msk.f32.mxu0 %vm979_vm0, %v980_v1  ;;  %v762_v5 = vpack.c.bf16 %v176_v3, %v175_v2  ;;  %v178_v6 = vld [vmem:[#allocation6 + $0x18] sm:$0xff]  ;;  %vm179_vm1 = vcmask 261120   ;;  %s981_s15 = smov 112   ;;  %s982_s17 = smov 96  }
  0x57   : > { %741 = vmatprep.subr.mxu1 %v980_v1  ;;  %743 = vmatprep.mubr.msk.f32.mxu1 %vm979_vm0, %v980_v1  ;;  %v765_v7 = vpack.c.bf16 %v178_v6, %v177_v4  ;;  %v174_v8 = vld [vmem:[%s149_s29] sm:$0xff]  ;;  %s983_s27 = smov 80   ;;  %vm258_vm2 = vcmask 130048   ;;  %vm333_vm3 = vcmask 64512   ;;  %s984_s22 = smov 48  }
  0x58   : > { %763 = vmatpush3.bf16.msra.mxu0 %v762_v5  ;;  %s985_s23 = smov 64   ;;  %s986_s28 = smov 16  }
  0x59   : > { %764 = vmatprep.subr.bf16.mxu0 %v978_v0  ;;  %s987_s30 = smov 32   ;;  %s714_s3 = sshll.u32 %s1025_s13, 7 }
  0x5a   : > { %s173_s4 = scalar_lea.vmem [#allocation8], %s703_s26  ;;  %s1187_s18 = scalar_lea.hbm %s1235_s2, %s714_s3 }
  0x5b   : > { %s616_s5 = sshll.u32 %s173_s4, 4  ;;  %s603_s13 = scalar_lea.sflag [#allocation5], %s1140_s20  ;;  %s1189_s5 = int_to_ptr.vmem [resolvable:$true] %s616_s5 }
  0x5c   : > { %766 = vmatpush3.bf16.msra.mxu0 %v765_v7  ;;  %s902_s24 = scalar_lea.vmem %s1189_s5, 128  ;;  %s988_s25 = smov [#allocation8]  }
  0x5d   : > { %751 = vmatprep.subr.mxu0 %v980_v1  ;;  %p903_p4 = scmp.ne.s32.totalorder %s1189_s5, %s902_s24  ;;  %s906_s26 = sshll.u32 %s988_s25, 4  ;;  %s907_s26 = int_to_ptr.vmem [resolvable:$false] %s906_s26 }
  0x5e   : > { %s908_s19 = scalar_lea.vmem %s907_s26, 256  ;;  %p909_p10 = scmp.lt.s32.totalorder %s1189_s5, %s907_s26 }
  0x5f   : > { %739 = vmatmul.mubr.msk.f32.vlgmr.msra.gmra.mrb[0].mxu0 %vm179_vm1, %v174_v8  ;;  %p904_p6 = pnand %p903_p4, %p1095_p12  ;;  %p910_p13 = scmp.lt.s32.totalorder %s908_s19, %s902_s24 }
  0x60   : > { %753 = vmatprep.mubr.msk.f32.mxu0 %vm979_vm0, %v980_v1 }
  0x61   : > { %p905_p8 = pneg %p904_p6  ;;  %p911_p3 = por %p910_p13, %p909_p10 }
  0x63   : > { %p912_p7 = pnand %p911_p3, %p905_p8 }
 0x132   : > { %v249_v9 = vpop.f32.mrb[0].mxu0 }
 0x133   : > { %426 = vrot.lane.b32.xlu1 %v249_v9, %s981_s15  ;;  %256 = vrot.lane.b32.xlu0 %v249_v9, %s982_s17  ;;  %v740_v10 = vpop.f32.mrb[1].mxu0 }
 0x137   : > { %428 = vrot.lane.b32.xlu0 %v249_v9, %s983_s27 }
 0x1a5   : > { %v257_v11 = vpop.permute.xlu0 %256  ;;  %v427_v13 = vpop.permute.xlu1 %426 }
 0x1a6   : > { %742 = vmatpush3.xpose.msk.msra.mxu1 %vm258_vm2, %v257_v11 }
 0x1a7   : > { %746 = vmatprep.subr.mxu1 %v980_v1 }
 0x1a9   : > { %744 = vmatmul.mubr.msk.f32.vlgmr.msra.gmra.mrb[0].mxu1 %vm258_vm2, %v249_v9  ;;  %v429_v12 = vpop.permute.xlu0 %428 }
 0x1aa   : > { %752 = vmatpush3.xpose.msk.msra.mxu0 %vm258_vm2, %v429_v12  ;;  %748 = vmatprep.mubr.msk.f32.mxu1 %vm979_vm0, %v980_v1 }
 0x1ad   : > { %754 = vmatmul.mubr.msk.f32.vlgmr.msra.gmra.mrb[2].mxu0 %vm258_vm2, %v427_v13 }
 0x27c   : > { %v329_v14 = vpop.f32.mrb[0].mxu1 }
 0x27d   : > { %v745_v15 = vpop.f32.mrb[1].mxu1  ;;  %v334_v16 = vsel %vm333_vm3, %v329_v14, -inf }
 0x27e   : > { %335 = vmax.xlane.f32.xlu1 %v334_v16 }
 0x280   : > { %v500_v17 = vpop.f32.mrb[2].mxu0 }
 0x281   : > { %v755_v18 = vpop.f32.mrb[3].mxu0  ;;  %v504_v19 = vsel %vm333_vm3, %v500_v17, -inf }
 0x282   : > { %505 = vmax.xlane.f32.xlu0 %v504_v19 }
 0x28f   : > { %513 = vrot.lane.b32.xlu1 %v249_v9, %s984_s22 }
 0x298   : > { %343 = vrot.lane.b32.xlu0 %v249_v9, %s985_s23 }
 0x29c   : > { %591 = vrot.lane.b32.xlu0 %v249_v9, %s986_s28 }
 0x30b   : > { %v336_v20 = vpop.xlane.xlu1 %335 }
 0x30c   : > { %v337_v21 = vsub.f32 %v329_v14, %v336_v20 }
 0x30e   : > { %v338_v22 = vmul.f32 1.442695, %v337_v21 }
 0x30f   : > { %v506_v23 = vpop.xlane.xlu0 %505  ;;  %v514_v28 = vpop.permute.xlu1 %513 }
 0x310   : > { %836 = vpow2.f32 %v338_v22  ;;  %v507_v24 = vsub.f32 %v500_v17, %v506_v23 }
 0x312   : > { %v508_v25 = vmul.f32 1.442695, %v507_v24 }
 0x313   : > { %v344_v26 = vpop.permute.xlu0 %343 }
 0x314   : > { %838 = vpow2.f32 %v508_v25  ;;  %747 = vmatpush3.msra.mxu1 %v344_v26 }
 0x315   : > { %756 = vmatprep.subr.mxu1 %v980_v1 }
 0x317   : > { %v592_v39 = vpop.permute.xlu0 %591 }
 0x31a   : > { %v837_v27 = vpop.eup %836 }
 0x31b   : > { %749 = vmatmul.mubr.msk.f32.vlgmr.msra.gmra.mrb[2].mxu1 %vm333_vm3, %v837_v27  ;;  %v340_v29 = vsel %vm333_vm3, %v837_v27, 0.0 }
 0x31c   : > { %757 = vmatpush3.msra.mxu1 %v514_v28  ;;  %341 = vadd.xlane.f32.xlu0 %v340_v29 }
 0x31d   : > { %758 = vmatprep.mubr.msk.f32.mxu1 %vm979_vm0, %v980_v1 }
 0x31e   : > { %v839_v30 = vpop.eup %838 }
 0x31f   : > { %759 = vmatmul.mubr.msk.f32.vlgmr.msra.gmra.mrb[4].mxu1 %vm333_vm3, %v839_v30  ;;  %v510_v31 = vsel %vm333_vm3, %v839_v30, 0.0 }
 0x320   : > { %511 = vadd.xlane.f32.xlu1 %v510_v31 }
 0x331   : > { %421 = vrot.lane.b32.xlu1 %v249_v9, %s987_s30 }
 0x3a9   : > { %v342_v42 = vpop.xlane.xlu0 %341 }
 0x3ad   : > { %v512_v32 = vpop.xlane.xlu1 %511 }
 0x3ae   : > { %840 = vrcp.f32 %v512_v32 }
 0x3af   : > { %842 = vrcp.f32 %v342_v42 }
 0x3b1   : > { %v422_v45 = vpop.permute.xlu1 %421 }
 0x3b8   : > { %v841_v35 = vpop.eup %840 }
 0x3b9   : > { %v843_v43 = vpop.eup %842 }
 0x3ee   : > { %v415_v33 = vpop.f32.mrb[2].mxu1 }
 0x3ef   : > { %v750_v34 = vpop.f32.mrb[3].mxu1  ;;  %v420_v44 = vmul.f32 %v843_v43, %v415_v33 }
 0x3f1   : > { %v424_v46 = vadd.f32 %v422_v45, %v420_v44 }
 0x3f2   : > { %v585_v36 = vpop.f32.mrb[4].mxu1 }
 0x3f3   : > { %v590_v37 = vmul.f32 %v841_v35, %v585_v36  ;;  %v760_v38 = vpop.f32.mrb[5].mxu1  ;;  %v425_v47 = vmax.f32 %v424_v46, 0.0 }
 0x3f5   : > { %v594_v40 = vadd.f32 %v592_v39, %v590_v37 }
 0x3f7   : > { %v595_v41 = vmax.f32 %v594_v40, 0.0 }
 0x3f9   : > { %597 = vrot.lane.b32.xlu0 %v595_v41, %s986_s28 }
 0x46b   : > { %v598_v48 = vpop.permute.xlu0 %597 }
 0x46c   : > { %v600_v49 = vsel %vm258_vm2, %v425_v47, %v598_v48 }
 0x46d   : > { %601 = vst.msk [vmem:[%s173_s4] sm:$0xff] %vm179_vm1, %v600_v49 }
 0x46e   : > { %915 = shalt.err (!%p912_p7)
}
 0x46f   : > { %s916_s20 = scalar_lea.hbm %s1187_s18, 128  ;;  %s920_s17 = scalar_lea.hbm %s1235_s2, 256 }
 0x470   : > { %p917_p9 = scmp.ne.s32.totalorder %s1187_s18, %s916_s20  ;;  %p921_p0 = scmp.lt.u32.totalorder %s1187_s18, %s1235_s2 }
 0x471   : > { %p922_p11 = scmp.lt.u32.totalorder %s920_s17, %s916_s20  ;;  %p924_p4 = scmp.lt.u32.totalorder %s916_s20, %s1187_s18 }
 0x472   : > { %p918_p2 = pnand %p917_p9, %p1095_p12 }
 0x473   : > { %p923_p1 = por %p922_p11, %p921_p0 }
 0x474   : > { %p919_p5 = pneg %p918_p2 }
 0x475   : > { %p925_p6 = por %p924_p4, %p923_p1 }
 0x477   : > { %p926_p8 = pnand %p925_p6, %p919_p5 }
 0x479   : > { %929 = shalt.err (!%p926_p8)
}
 0x47a   : > { %773 = dma.vmem_to_hbm [thread:$0]  (%p1095_p12), %s1189_s5, 128, %s1187_s18, %s603_s13  }
 0x47b PF: > { %s628_s23 = sand.u32 1, %s960_s9   ;;  %p1250_p10 = scmp.ne.s32.totalorder %s1240_s16, 0 }
 0x47c   : > { %p1251_p13 = scmp.ge.s32.totalorder %s972_s12, 2  ;;  %s629_s28 = scalar_lea.sflag [#allocation5], %s628_s23 }
 0x47e   : > { %p784_p3 = pnand %p1251_p13, %p1250_p10 }
 0x480   : > { %955 = dma.done.wait (!%p784_p3), %s629_s28, 128  }
 0x481   : > { %957 = vsyncadd (!%p784_p3), %s629_s28, 4294967168  ;;  %p16_p7 = scmp.ge.s32.totalorder %s1060_s21, 4   ;;  %s1252_s9 = smov %s964_s10 }
 0x482   : > { %s1253_s10 = smov %s968_s11  ;;  %s1254_s11 = smov %s1091_s8 }
 0x483   : > { %s1255_s12 = smov %s1060_s21  ;;  %18 = sbr.rel (!%p16_p7) target bundleno = 6 (0x6), region = 77 }
 0x48a   :  { %634 = vsyncpa [#allocation4], 1 }
 0x48b   :  { %636 = vsyncpa [#allocation4 + $0x1], 1 }
 0x48c   :  { %637 = vsyncpa [#allocation7], 1 }
 0x48d   :  { %638 = vsyncpa [#allocation5], 1 }
 0x48e   :  { %640 = vsyncpa [#allocation5 + $0x1], 1 }

</bundles_post_ra>
